<compile_context>
chip_gen: v5e
topology: v5e:2x2
jax: 0.10.0
libtpu: 0.0.40
codegen_flags: <defaults>
</compile_context>

<pallas_src>
import functools
import math

import jax
import jax.numpy as jnp
from jax import lax
from jax.experimental import pallas as pl
from jax.experimental.pallas import tpu as pltpu


# ----------------------------------------------------------------------------
# small helpers
# ----------------------------------------------------------------------------
def _round_up(x: int, m: int) -> int:
    return ((x + m - 1) // m) * m


def yarn_get_mscale(scale: float = 1.0, mscale: float = 1.0) -> float:
    if scale <= 1:
        return 1.0
    return 0.1 * mscale * math.log(scale) + 1.0


# ----------------------------------------------------------------------------
# Pallas kernels
# ----------------------------------------------------------------------------
def _linear_kernel(x_ref, wt_ref, o_ref):
    # x_ref: (TM, IN); wt_ref: (IN, OUT) -- weight pre-transposed in wrapper.
    # Plain NN contraction -> straight vmatmul push, no in-kernel transpose.
    o_ref[...] = jnp.dot(
        x_ref[...], wt_ref[...], preferred_element_type=jnp.float32
    ).astype(o_ref.dtype)


def linear(x: jax.Array, weight: jax.Array, *, tm: int = 128) -> jax.Array:
    """y = x @ weight.T  (PyTorch nn.Linear layout, bias=False)."""
    T, IN = x.shape
    OUT, IN2 = weight.shape
    assert IN == IN2, "in_features mismatch"
    wt = weight.T  # one-time (IN, OUT) transpose outside the kernel

    # Token-tile size: 128 rows (v5e MXU height); shrink for tiny inputs.
    # NOTE(perf): for v6e/v7x production shapes, cast x/wt to bf16 here and
    # keep preferred_element_type=f32 (2x MXU rate, half the DMA bytes); kept
    # f32 in this demo so the correctness check stays tight.
    tm = min(tm, _round_up(max(T, 1), 8))
    T_pad = _round_up(T, tm)
    if T_pad != T:
        x = jnp.pad(x, ((0, T_pad - T), (0, 0)))

    itemsize = jnp.dtype(x.dtype).itemsize
    out = pl.pallas_call(
        _linear_kernel,
        out_shape=jax.ShapeDtypeStruct((T_pad, OUT), x.dtype),
        grid_spec=pltpu.PrefetchScalarGridSpec(
            num_scalar_prefetch=0,
            grid=(T_pad // tm,),
            in_specs=[
                pl.BlockSpec((tm, IN), lambda i: (i, 0)),    # token tile
                pl.BlockSpec((IN, OUT), lambda i: (0, 0)),   # weight resident
            ],
            out_specs=pl.BlockSpec((tm, OUT), lambda i: (i, 0)),
        ),
        compiler_params=pltpu.CompilerParams(
            dimension_semantics=("parallel",),
        ),
        cost_estimate=pl.CostEstimate(
            flops=2 * T_pad * IN * OUT,
            transcendentals=0,
            bytes_accessed=(T_pad * IN + IN * OUT + T_pad * OUT) * itemsize,
        ),
    )(x, wt)
    return out[:T]


def _rmsnorm_kernel(x_ref, g_ref, o_ref, *, eps):
    x = x_ref[...].astype(jnp.float32)
    var = jnp.mean(x * x, axis=-1, keepdims=True)
    o_ref[...] = (x * lax.rsqrt(var + eps) * g_ref[...]).astype(o_ref.dtype)


def rmsnorm(x: jax.Array, gamma: jax.Array, *, eps: float = 1e-6,
            tm: int = 128) -> jax.Array:
    T, D = x.shape
    g = gamma.reshape(1, D).astype(jnp.float32)
    tm = min(tm, _round_up(max(T, 1), 8))
    T_pad = _round_up(T, tm)
    if T_pad != T:
        x = jnp.pad(x, ((0, T_pad - T), (0, 0)))
    out = pl.pallas_call(
        functools.partial(_rmsnorm_kernel, eps=eps),
        out_shape=jax.ShapeDtypeStruct((T_pad, D), x.dtype),
        grid_spec=pltpu.PrefetchScalarGridSpec(
            num_scalar_prefetch=0,
            grid=(T_pad // tm,),
            in_specs=[
                pl.BlockSpec((tm, D), lambda i: (i, 0)),
                pl.BlockSpec((1, D), lambda i: (0, 0)),
            ],
            out_specs=pl.BlockSpec((tm, D), lambda i: (i, 0)),
        ),
        compiler_params=pltpu.CompilerParams(
            dimension_semantics=("parallel",),
        ),
    )(x, g)
    return out[:T]


def _rope_kernel(x1_ref, x2_ref, cos_ref, sin_ref, o1_ref, o2_ref):
    # Interleaved (GPT-J / non-neox) rotation on pre-split even/odd halves.
    x1 = x1_ref[...]
    x2 = x2_ref[...]
    c = cos_ref[...]
    s = sin_ref[...]
    o1_ref[...] = x1 * c - x2 * s
    o2_ref[...] = x2 * c + x1 * s


def apply_interleaved_rope(x: jax.Array, cos: jax.Array, sin: jax.Array,
                           *, tm: int = 128) -> jax.Array:
    """x: [T, n_heads, d] (d even); cos/sin: [T, d//2]."""
    T, n, d = x.shape
    half = d // 2
    x1 = x[..., 0::2].reshape(T, n * half)
    x2 = x[..., 1::2].reshape(T, n * half)
    cos_t = jnp.tile(cos, (1, n))
    sin_t = jnp.tile(sin, (1, n))

    tm = min(tm, _round_up(max(T, 1), 8))
    T_pad = _round_up(T, tm)
    if T_pad != T:
        pad = ((0, T_pad - T), (0, 0))
        x1, x2 = jnp.pad(x1, pad), jnp.pad(x2, pad)
        cos_t, sin_t = jnp.pad(cos_t, pad), jnp.pad(sin_t, pad)

    W = n * half
    o1, o2 = pl.pallas_call(
        _rope_kernel,
        out_shape=(
            jax.ShapeDtypeStruct((T_pad, W), x.dtype),
            jax.ShapeDtypeStruct((T_pad, W), x.dtype),
        ),
        grid_spec=pltpu.PrefetchScalarGridSpec(
            num_scalar_prefetch=0,
            grid=(T_pad // tm,),
            in_specs=[pl.BlockSpec((tm, W), lambda i: (i, 0))] * 4,
            out_specs=(
                pl.BlockSpec((tm, W), lambda i: (i, 0)),
                pl.BlockSpec((tm, W), lambda i: (i, 0)),
            ),
        ),
        compiler_params=pltpu.CompilerParams(
            dimension_semantics=("parallel",),
        ),
    )(x1, x2, cos_t, sin_t)
    o1 = o1[:T].reshape(T, n, half)
    o2 = o2[:T].reshape(T, n, half)
    return jnp.stack([o1, o2], axis=-1).reshape(T, n, d)


def _mla_attn_kernel(q_ref, k_ref, v_ref, o_ref, *, scaling):
    # One head per grid step; q/k: [1, T, Dq], v/o: [1, T, Dv].
    q = q_ref[0]
    k = k_ref[0]
    v = v_ref[0]
    s = lax.dot_general(
        q, k, dimension_numbers=(((1,), (1,)), ((), ())),
        preferred_element_type=jnp.float32,
    ) * scaling
    T = s.shape[0]
    row = lax.broadcasted_iota(jnp.int32, (T, T), 0)
    col = lax.broadcasted_iota(jnp.int32, (T, T), 1)
    s = jnp.where(row >= col, s, -1e30)          # causal mask
    m = jnp.max(s, axis=-1, keepdims=True)
    p = jnp.exp(s - m)
    l = jnp.sum(p, axis=-1, keepdims=True)
    o = jnp.dot(p.astype(v.dtype), v, preferred_element_type=jnp.float32) / l
    o_ref[0] = o.astype(o_ref.dtype)


def mla_attention(q: jax.Array, k: jax.Array, v: jax.Array,
                  *, scaling: float) -> jax.Array:
    """Causal self-attention. q,k: [T, H, Dq]; v: [T, H, Dv] -> [T, H, Dv]."""
    T, H, Dq = q.shape
    Dv = v.shape[-1]
    T_pad = _round_up(max(T, 1), 8)
    if T_pad != T:
        pad = ((0, T_pad - T), (0, 0), (0, 0))
        q, k, v = jnp.pad(q, pad), jnp.pad(k, pad), jnp.pad(v, pad)
    # [H, T, D] layout -> one head per grid step (parallel axis).
    qh = jnp.transpose(q, (1, 0, 2))
    kh = jnp.transpose(k, (1, 0, 2))
    vh = jnp.transpose(v, (1, 0, 2))

    out = pl.pallas_call(
        functools.partial(_mla_attn_kernel, scaling=scaling),
        out_shape=jax.ShapeDtypeStruct((H, T_pad, Dv), q.dtype),
        grid_spec=pltpu.PrefetchScalarGridSpec(
            num_scalar_prefetch=0,
            grid=(H,),
            in_specs=[
                pl.BlockSpec((1, T_pad, Dq), lambda h: (h, 0, 0)),
                pl.BlockSpec((1, T_pad, Dq), lambda h: (h, 0, 0)),
                pl.BlockSpec((1, T_pad, Dv), lambda h: (h, 0, 0)),
            ],
            out_specs=pl.BlockSpec((1, T_pad, Dv), lambda h: (h, 0, 0)),
        ),
        compiler_params=pltpu.CompilerParams(
            dimension_semantics=("parallel",),
        ),
    )(qh, kh, vh)
    return jnp.transpose(out, (1, 0, 2))[:T]


# ----------------------------------------------------------------------------
# DeepSeek-YaRN rotary cache (host-side precompute, mirrors module __init__)
# ----------------------------------------------------------------------------
def _yarn_find_correction_dim(num_rot, dim, base, max_pos):
    return (dim * math.log(max_pos / (num_rot * 2 * math.pi))) / (2 * math.log(base))


def _yarn_find_correction_range(low_rot, high_rot, dim, base, max_pos):
    low = math.floor(_yarn_find_correction_dim(low_rot, dim, base, max_pos))
    high = math.ceil(_yarn_find_correction_dim(high_rot, dim, base, max_pos))
    return max(low, 0), min(high, dim - 1)


def _yarn_linear_ramp_mask(low, high, dim):
    if low == high:
        high += 0.001
    ramp = (jnp.arange(dim, dtype=jnp.float32) - low) / (high - low)
    return jnp.clip(ramp, 0.0, 1.0)


def build_deepseek_yarn_cache(rotary_dim, base, rope_scaling):
    factor = float(rope_scaling["factor"])
    orig_max = int(rope_scaling["original_max_position_embeddings"])
    beta_fast = float(rope_scaling.get("beta_fast", 32))
    beta_slow = float(rope_scaling.get("beta_slow", 1))
    mscale = float(rope_scaling.get("mscale", 1.0))
    mscale_all_dim = float(rope_scaling.get("mscale_all_dim", 0.0))
    attn_factor = 1.0
    extrapolation_factor = 1.0

    pos_freqs = base ** (jnp.arange(0, rotary_dim, 2, dtype=jnp.float32) / rotary_dim)
    inv_freq_extra = 1.0 / pos_freqs
    inv_freq_inter = 1.0 / (factor * pos_freqs)
    low, high = _yarn_find_correction_range(beta_fast, beta_slow, rotary_dim,
                                            base, orig_max)
    mask = (1.0 - _yarn_linear_ramp_mask(low, high, rotary_dim // 2)) * extrapolation_factor
    inv_freq = inv_freq_inter * (1.0 - mask) + inv_freq_extra * mask
    m = (yarn_get_mscale(factor, mscale) /
         yarn_get_mscale(factor, mscale_all_dim) * attn_factor)
    t = jnp.arange(int(orig_max * factor), dtype=jnp.float32)
    freqs = jnp.einsum("i,j->ij", t, inv_freq)
    return jnp.cos(freqs) * m, jnp.sin(freqs) * m


# ----------------------------------------------------------------------------
# The module
# ----------------------------------------------------------------------------
class DeepseekV2AttentionPallas:
    def __init__(self, key, *, hidden_size, num_heads, qk_nope_head_dim,
                 qk_rope_head_dim, v_head_dim, q_lora_rank, kv_lora_rank,
                 rope_theta=10000.0, rope_scaling=None,
                 max_position_embeddings=8192, rms_norm_eps=1e-6):
        self.hidden_size = hidden_size
        self.num_heads = num_heads
        self.num_local_heads = num_heads          # attn_tp_size == 1
        self.qk_nope_head_dim = qk_nope_head_dim
        self.qk_rope_head_dim = qk_rope_head_dim
        self.qk_head_dim = qk_nope_head_dim + qk_rope_head_dim
        self.v_head_dim = v_head_dim
        self.q_lora_rank = q_lora_rank
        self.kv_lora_rank = kv_lora_rank
        self.rms_norm_eps = rms_norm_eps
        self.max_position_embeddings = max_position_embeddings
        self.scaling = self.qk_head_dim ** (-0.5)

        ks = jax.random.split(key, 6)
        init = lambda k, shape: jax.random.normal(k, shape, dtype=jnp.float32) * 0.02
        if q_lora_rank is not None:
            self.q_a_proj_w = init(ks[0], (q_lora_rank, hidden_size))
            self.q_a_layernorm_w = jnp.ones((q_lora_rank,), jnp.float32)
            self.q_b_proj_w = init(ks[1], (num_heads * self.qk_head_dim, q_lora_rank))
        else:
            self.q_proj_w = init(ks[0], (num_heads * self.qk_head_dim, hidden_size))
        self.kv_a_proj_with_mqa_w = init(
            ks[2], (kv_lora_rank + qk_rope_head_dim, hidden_size))
        self.kv_a_layernorm_w = jnp.ones((kv_lora_rank,), jnp.float32)
        self.kv_b_proj_w = init(
            ks[3], (num_heads * (qk_nope_head_dim + v_head_dim), kv_lora_rank))
        self.o_proj_w = init(ks[4], (hidden_size, num_heads * v_head_dim))

        assert rope_scaling is not None
        rope_scaling = dict(rope_scaling)
        rope_scaling["rope_type"] = "deepseek_yarn"
        self.cos_cache, self.sin_cache = build_deepseek_yarn_cache(
            qk_rope_head_dim, rope_theta, rope_scaling)
        mscale_all_dim = rope_scaling.get("mscale_all_dim", False)
        scaling_factor = rope_scaling["factor"]
        mscale = yarn_get_mscale(scaling_factor, float(mscale_all_dim))
        self.scaling = self.scaling * mscale * mscale

    def __call__(self, positions: jax.Array, hidden_states: jax.Array) -> jax.Array:
        T = hidden_states.shape[0]
        if T == 0:
            # matches the torch short-circuit (no reduce here, tp_size==1)
            return hidden_states
        H = self.num_local_heads
        nope, rope_d, vd = self.qk_nope_head_dim, self.qk_rope_head_dim, self.v_head_dim

        # --- q path ---
        if self.q_lora_rank is not None:
            q = linear(hidden_states, self.q_a_proj_w)
            q = rmsnorm(q, self.q_a_layernorm_w, eps=self.rms_norm_eps)
            q = linear(q, self.q_b_proj_w)
        else:
            q = linear(hidden_states, self.q_proj_w)
        q = q.reshape(T, H, self.qk_head_dim)
        q_nope = q[..., :nope]
        q_pe = q[..., nope:]

        # --- kv latent path ---
        latent = linear(hidden_states, self.kv_a_proj_with_mqa_w)
        kv_a = latent[:, : self.kv_lora_rank]
        k_pe = latent[:, self.kv_lora_rank:]                   # [T, rope_d]
        kv_a = rmsnorm(kv_a, self.kv_a_layernorm_w, eps=self.rms_norm_eps)
        kv = linear(kv_a, self.kv_b_proj_w).reshape(T, H, nope + vd)
        k_nope = kv[..., :nope]
        v = kv[..., nope:]

        # --- rotary (deepseek_yarn, is_neox_style=False): fuse q_pe + k_pe ---
        cos = self.cos_cache[positions]
        sin = self.sin_cache[positions]
        pe = jnp.concatenate([q_pe, k_pe[:, None, :]], axis=1)  # [T, H+1, rope_d]
        pe = apply_interleaved_rope(pe, cos, sin)
        q_pe = pe[:, :H, :]
        k_pe_rot = pe[:, H:, :]                                 # [T, 1, rope_d]

        qf = jnp.concatenate([q_nope, q_pe], axis=-1)
        kf = jnp.concatenate(
            [k_nope, jnp.broadcast_to(k_pe_rot, (T, H, rope_d))], axis=-1)

        # NOTE: the torch module zero-pads q/k/v head dims to 256 only to fit
        # RadixAttention's fixed page layout; zero padding is a numerical no-op
        # (padded q/k dims add 0 to the logits, padded v dims are sliced off),
        # so the Pallas attention runs on the true head dims.
        attn_out = mla_attention(qf, kf, v, scaling=self.scaling)   # [T, H, vd]
        attn_out = attn_out.reshape(T, H * vd)
        return linear(attn_out, self.o_proj_w)


# ----------------------------------------------------------------------------
# pure-JAX reference (mirrors the torch forward)
# ----------------------------------------------------------------------------
def _rope_ref(x, cos, sin):
    x1 = x[..., 0::2]
    x2 = x[..., 1::2]
    c = cos[:, None, :]
    s = sin[:, None, :]
    o1 = x1 * c - x2 * s
    o2 = x2 * c + x1 * s
    return jnp.stack([o1, o2], axis=-1).reshape(x.shape)


def _rmsnorm_ref(x, w, eps):
    var = jnp.mean(x.astype(jnp.float32) ** 2, axis=-1, keepdims=True)
    return (x.astype(jnp.float32) * lax.rsqrt(var + eps) * w).astype(x.dtype)


def reference_forward(attn, positions, hidden_states):
    hp = lax.Precision.HIGHEST
    T = hidden_states.shape[0]
    H = attn.num_local_heads
    nope, rope_d, vd = attn.qk_nope_head_dim, attn.qk_rope_head_dim, attn.v_head_dim

    if attn.q_lora_rank is not None:
        q = jnp.matmul(hidden_states, attn.q_a_proj_w.T, precision=hp)
        q = _rmsnorm_ref(q, attn.q_a_layernorm_w, attn.rms_norm_eps)
        q = jnp.matmul(q, attn.q_b_proj_w.T, precision=hp)
    else:
        q = jnp.matmul(hidden_states, attn.q_proj_w.T, precision=hp)
    q = q.reshape(T, H, attn.qk_head_dim)
    q_nope, q_pe = q[..., :nope], q[..., nope:]

    latent = jnp.matmul(hidden_states, attn.kv_a_proj_with_mqa_w.T, precision=hp)
    kv_a, k_pe = latent[:, : attn.kv_lora_rank], latent[:, attn.kv_lora_rank:]
    kv_a = _rmsnorm_ref(kv_a, attn.kv_a_layernorm_w, attn.rms_norm_eps)
    kv = jnp.matmul(kv_a, attn.kv_b_proj_w.T, precision=hp).reshape(T, H, nope + vd)
    k_nope, v = kv[..., :nope], kv[..., nope:]

    cos, sin = attn.cos_cache[positions], attn.sin_cache[positions]
    q_pe = _rope_ref(q_pe, cos, sin)
    k_pe = _rope_ref(k_pe[:, None, :], cos, sin)

    qf = jnp.concatenate([q_nope, q_pe], axis=-1)
    kf = jnp.concatenate([k_nope, jnp.broadcast_to(k_pe, (T, H, rope_d))], axis=-1)

    s = jnp.einsum("qhd,khd->hqk", qf, kf, precision=hp) * attn.scaling
    mask = jnp.tril(jnp.ones((T, T), dtype=bool))
    s = jnp.where(mask[None], s, -jnp.inf)
    p = jax.nn.softmax(s, axis=-1)
    o = jnp.einsum("hqk,khd->qhd", p, v, precision=hp).reshape(T, H * vd)
    return jnp.matmul(o, attn.o_proj_w.T, precision=hp)


# ----------------------------------------------------------------------------
if __name__ == "__main__":
    # Small synthetic config consistent with DeepseekV2Attention.__init__.
    T = 8
    hidden_size = 256
    num_heads = 2
    qk_nope_head_dim = 128
    qk_rope_head_dim = 64
    v_head_dim = 128
    q_lora_rank = 128
    kv_lora_rank = 128
    rope_theta = 10000.0
    rope_scaling = {
        "factor": 4.0,
        "original_max_position_embeddings": 64,
        "beta_fast": 32,
        "beta_slow": 1,
        "mscale": 1.0,
        "mscale_all_dim": 1.0,
    }

    key = jax.random.PRNGKey(0)
    k_param, k_h = jax.random.split(key)

    attn = DeepseekV2AttentionPallas(
        k_param,
        hidden_size=hidden_size,
        num_heads=num_heads,
        qk_nope_head_dim=qk_nope_head_dim,
        qk_rope_head_dim=qk_rope_head_dim,
        v_head_dim=v_head_dim,
        q_lora_rank=q_lora_rank,
        kv_lora_rank=kv_lora_rank,
        rope_theta=rope_theta,
        rope_scaling=rope_scaling,
        max_position_embeddings=256,
    )

    hidden_states = jax.random.normal(k_h, (T, hidden_size), dtype=jnp.float32)
    positions = jnp.arange(T, dtype=jnp.int32)

    out = attn(positions, hidden_states)
    jax.block_until_ready(out)

    ref = reference_forward(attn, positions, hidden_states)
    assert out.shape == (T, hidden_size)
    max_diff = float(jnp.max(jnp.abs(out - ref)))
    assert jnp.allclose(out, ref, atol=3e-3, rtol=3e-3), (
        f"mismatch vs reference, max abs diff {max_diff}")

    print("KERNEL_OK")
</pallas_src>

<mosaic_0001>
module attributes {stable_mosaic.version = 11 : i64} {
  func.func @_linear_kernel(%arg0: i32, %arg1: memref<8x256xf32, #tpu.memory_space<vmem>>, %arg2: memref<256x128xf32, #tpu.memory_space<vmem>>, %arg3: memref<8x128xf32, #tpu.memory_space<vmem>>) attributes {dimension_semantics = [#tpu.dimension_semantics<parallel>], iteration_bounds = array<i64: 1>, scalar_prefetch = 0 : i64, scratch_operands = 0 : i64, tpu.core_type = #tpu.core_type<tc>, window_params = [{transform_indices = @transform_0, window_bounds = array<i64: 8, 256>}, {pipeline_mode = #tpu.pipeline_mode<synchronous>, transform_indices = @transform_1, window_bounds = array<i64: 256, 128>}, {transform_indices = @transform_2, window_bounds = array<i64: 8, 128>}]} {
    %c0 = arith.constant 0 : index
    %c0_0 = arith.constant 0 : index
    %0 = vector.load %arg1[%c0, %c0_0] : memref<8x256xf32, #tpu.memory_space<vmem>>, vector<8x256xf32>
    %c0_1 = arith.constant 0 : index
    %c0_2 = arith.constant 0 : index
    %1 = vector.load %arg2[%c0_1, %c0_2] : memref<256x128xf32, #tpu.memory_space<vmem>>, vector<256x128xf32>
    %cst = arith.constant dense<0.000000e+00> : vector<8x128xf32>
    %2 = tpu.matmul %0, %1, %cst {dimension_numbers = #tpu.dot_dimension_numbers<[1], [0], [0], [1], [0, 0, 1, 1], [], []>} : vector<8x256xf32>, vector<256x128xf32>, vector<8x128xf32> -> vector<8x128xf32>
    %c0_3 = arith.constant 0 : index
    %c0_4 = arith.constant 0 : index
    %3 = vector.load %arg3[%c0_3, %c0_4] : memref<8x128xf32, #tpu.memory_space<vmem>>, vector<8x128xf32>
    tpu.vector_store %arg3[%c0_3, %c0_4], %2 {strides = array<i32>} : memref<8x128xf32, #tpu.memory_space<vmem>>, vector<8x128xf32>,
    return
  }
  func.func @transform_0(%arg0: i32) -> (i32, i32) {
    %c0_i32 = arith.constant 0 : i32
    %c0_i32_0 = arith.constant 0 : i32
    return %arg0, %c0_i32 : i32, i32
  }
  func.func @transform_1(%arg0: i32) -> (i32, i32) {
    %c0_i32 = arith.constant 0 : i32
    %c0_i32_0 = arith.constant 0 : i32
    %c0_i32_1 = arith.constant 0 : i32
    return %c0_i32, %c0_i32_0 : i32, i32
  }
  func.func @transform_2(%arg0: i32) -> (i32, i32) {
    %c0_i32 = arith.constant 0 : i32
    %c0_i32_0 = arith.constant 0 : i32
    return %arg0, %c0_i32 : i32, i32
  }
}

</mosaic_0001>

<bundles_post_ra>
// kernel: tpu_custom_call.1
= control target key start
LH: loop header
LB: loop body
LE: loop exit
PB: predicated region body
PF: predicated region fallthrough
CT: control target
= control target key end

     0   :  { %7 = vsyncpa [#allocation3], 0  ;;  %s247_s0 = inlined_call_operand.hbm [shape: f32[8,256], index: 0, kind: input, shape index: {}]   ;;  %s248_s1 = inlined_call_operand.hbm [shape: f32[256,128], index: 1, kind: input, shape index: {}]   ;;  %s249_s2 = inlined_call_operand.hbm [shape: f32[8,128], index: 2, kind: output, shape index: {}]  }
   0x1   :  { %8 = vsyncpa [#allocation6], 0 }
   0x2   :  { %9 = vsyncpa [#allocation4], 0  ;;  %s15_s11 = sshll.u32 %s247_s0, 4  ;;  %s218_s12 = smov [#allocation2]   ;;  %s16_s11 = int_to_ptr.hbm [resolvable:$true] %s15_s11 }
   0x3   :  { %s17_s13 = sshll.u32 %s218_s12, 4  ;;  %s25_s16 = sshll.u32 %s248_s1, 4  ;;  %s18_s13 = int_to_ptr.vmem [resolvable:$true] %s17_s13  ;;  %s26_s16 = int_to_ptr.hbm [resolvable:$true] %s25_s16 }
   0x4   :  { %20 = dma.hbm_to_vmem [thread:$0]  %s16_s11, 256, %s18_s13, [#allocation3]  }
   0x5   :  { %s219_s17 = smov [#allocation5]   ;;  %s220_s19 = smov 128  }
   0x6   :  { %s27_s18 = sshll.u32 %s219_s17, 4  ;;  %s221_s20 = smov 8   ;;  %s28_s18 = int_to_ptr.vmem [resolvable:$true] %s27_s18 }
   0x7   :  { %33 = dma.hbm_to_vmem [thread:$0]  %s26_s16, 4096, %s28_s18, [#allocation6], %s220_s19, %s220_s19, %s221_s20  }
   0x8   :  { %212 = dma.done.wait [#allocation3], 256  }
   0x9   :  { %213 = vsyncadd [#allocation3], 4294967040 }
   0xa   :  { %214 = dma.done.wait [#allocation6], 4096  }
   0xb   :  { %215 = vsyncadd [#allocation6], 4294963200  ;;  %v59_v0 = vld [vmem:[#allocation5 + $0x78] sm:$0xff]  ;;  %v58_v2 = vld [vmem:[#allocation5 + $0x70] sm:$0xff]  ;;  %s222_s0 = smov [#allocation7]   ;;  %s124_s23 = sshll.u32 %s249_s2, 4  ;;  %s125_s23 = int_to_ptr.hbm [resolvable:$true] %s124_s23 }
   0xc   :  { %v75_v1 = vld [vmem:[#allocation5 + $0xf8] sm:$0xff]  ;;  %76 = vmatpush.msra.mxu0 %v59_v0  ;;  %v74_v3 = vld [vmem:[#allocation5 + $0xf0] sm:$0xff]  ;;  %v57_v4 = vld [vmem:[#allocation5 + $0x68] sm:$0xff]  ;;  %s122_s1 = sshll.u32 %s222_s0, 4  ;;  %s123_s1 = int_to_ptr.vmem [resolvable:$true] %s122_s1 }
   0xd   :  { %96 = vmatpush.msra.mxu1 %v75_v1  ;;  %v73_v5 = vld [vmem:[#allocation5 + $0xe8] sm:$0xff]  ;;  %v56_v6 = vld [vmem:[#allocation5 + $0x60] sm:$0xff]  ;;  %v55_v8 = vld [vmem:[#allocation5 + $0x58] sm:$0xff] }
   0xe   :  { %77 = vmatpush.msra.mxu0 %v58_v2  ;;  %v72_v7 = vld [vmem:[#allocation5 + $0xe0] sm:$0xff]  ;;  %v71_v9 = vld [vmem:[#allocation5 + $0xd8] sm:$0xff]  ;;  %v54_v10 = vld [vmem:[#allocation5 + $0x50] sm:$0xff] }
   0xf   :  { %97 = vmatpush.msra.mxu1 %v74_v3  ;;  %v70_v11 = vld [vmem:[#allocation5 + $0xd0] sm:$0xff]  ;;  %v53_v12 = vld [vmem:[#allocation5 + $0x48] sm:$0xff]  ;;  %v52_v14 = vld [vmem:[#allocation5 + $0x40] sm:$0xff] }
  0x10   :  { %78 = vmatpush.msra.mxu0 %v57_v4  ;;  %v69_v13 = vld [vmem:[#allocation5 + $0xc8] sm:$0xff]  ;;  %v68_v15 = vld [vmem:[#allocation5 + $0xc0] sm:$0xff]  ;;  %v51_v16 = vld [vmem:[#allocation5 + $0x38] sm:$0xff] }
  0x11   :  { %98 = vmatpush.msra.mxu1 %v73_v5  ;;  %v67_v17 = vld [vmem:[#allocation5 + $0xb8] sm:$0xff]  ;;  %v50_v18 = vld [vmem:[#allocation5 + $0x30] sm:$0xff]  ;;  %v49_v20 = vld [vmem:[#allocation5 + $0x28] sm:$0xff] }
  0x12   :  { %79 = vmatpush.msra.mxu0 %v56_v6  ;;  %v66_v19 = vld [vmem:[#allocation5 + $0xb0] sm:$0xff]  ;;  %v65_v21 = vld [vmem:[#allocation5 + $0xa8] sm:$0xff]  ;;  %v48_v22 = vld [vmem:[#allocation5 + $0x20] sm:$0xff] }
  0x13   :  { %99 = vmatpush.msra.mxu1 %v72_v7  ;;  %v64_v23 = vld [vmem:[#allocation5 + $0xa0] sm:$0xff]  ;;  %v47_v24 = vld [vmem:[#allocation5 + $0x18] sm:$0xff]  ;;  %v46_v26 = vld [vmem:[#allocation5 + $0x10] sm:$0xff] }
  0x14   :  { %80 = vmatpush.msra.mxu0 %v55_v8  ;;  %v63_v25 = vld [vmem:[#allocation5 + $0x98] sm:$0xff]  ;;  %v62_v27 = vld [vmem:[#allocation5 + $0x90] sm:$0xff]  ;;  %v45_v28 = vld [vmem:[#allocation5 + $0x8] sm:$0xff] }
  0x15   :  { %100 = vmatpush.msra.mxu1 %v71_v9  ;;  %v61_v29 = vld [vmem:[#allocation5 + $0x88] sm:$0xff]  ;;  %v44_v30 = vld [vmem:[#allocation5] sm:$0xff]  ;;  %v42_v32 = vld [vmem:[#allocation2] sm:$0xff] }
  0x16   :  { %81 = vmatpush.msra.mxu0 %v54_v10  ;;  %v60_v31 = vld [vmem:[#allocation5 + $0x80] sm:$0xff]  ;;  %v43_v33 = vld [vmem:[#allocation2 + $0x8] sm:$0xff] }
  0x17   :  { %101 = vmatpush.msra.mxu1 %v70_v11 }
  0x18   :  { %82 = vmatpush.msra.mxu0 %v53_v12 }
  0x19   :  { %102 = vmatpush.msra.mxu1 %v69_v13 }
  0x1a   :  { %83 = vmatpush.msra.mxu0 %v52_v14 }
  0x1b   :  { %103 = vmatpush.msra.mxu1 %v68_v15 }
  0x1c   :  { %84 = vmatpush.msra.mxu0 %v51_v16 }
  0x1d   :  { %104 = vmatpush.msra.mxu1 %v67_v17 }
  0x1e   :  { %85 = vmatpush.msra.mxu0 %v50_v18 }
  0x1f   :  { %105 = vmatpush.msra.mxu1 %v66_v19 }
  0x20   :  { %86 = vmatpush.msra.mxu0 %v49_v20 }
  0x21   :  { %106 = vmatpush.msra.mxu1 %v65_v21 }
  0x22   :  { %87 = vmatpush.msra.mxu0 %v48_v22 }
  0x23   :  { %107 = vmatpush.msra.mxu1 %v64_v23 }
  0x24   :  { %88 = vmatpush.msra.mxu0 %v47_v24 }
  0x25   :  { %108 = vmatpush.msra.mxu1 %v63_v25 }
  0x26   :  { %89 = vmatpush.msra.mxu0 %v46_v26 }
  0x27   :  { %109 = vmatpush.msra.mxu1 %v62_v27 }
  0x28   :  { %90 = vmatpush.msra.mxu0 %v45_v28 }
  0x29   :  { %110 = vmatpush.msra.mxu1 %v61_v29 }
  0x2a   :  { %91 = vmatpush.msra.mxu0 %v44_v30 }
  0x2b   :  { %111 = vmatpush.msra.mxu1 %v60_v31  ;;  %92 = vmatmul.f32.vlgmr.msra.gmra.mxu0 %v42_v32 }
  0x2c   :  { %112 = vmatmul.f32.vlgmr.msra.gmra.mxu1 %v43_v33 }
  0xa8   :  { %v93_v34 = vpop.f32.mrf.mxu0 }
  0xa9   :  { %v113_v35 = vpop.f32.mrf.mxu1 }
  0xaa   :  { %v114_v36 = vadd.f32 %v113_v35, %v93_v34 }
  0xac   :  { %116 = vst [vmem:[#allocation7] sm:$0xff] %v114_v36 }
  0xad   :  { %127 = dma.vmem_to_hbm [thread:$0]  %s123_s1, 128, %s125_s23, [#allocation4]  }
  0xae   :  { %216 = dma.done.wait [#allocation4], 128  }
  0xaf   :  { %217 = vsyncadd [#allocation4], 4294967168 }
  0xb0   :  { %132 = vsyncpa [#allocation3], 1 }
  0xb1   :  { %133 = vsyncpa [#allocation6], 1 }
  0xb2   :  { %134 = vsyncpa [#allocation4], 1 }

</bundles_post_ra>
